<compile_context>
chip_gen: v6e
topology: v6e:2x2x1
jax: 0.10.0
libtpu: 0.0.40
codegen_flags: <defaults>
</compile_context>

<pallas_src>
import functools

import numpy as np
import jax
import jax.numpy as jnp
from jax.experimental import pallas as pl
from jax.experimental.pallas import tpu as pltpu

EPS = 1e-5  # PyTorch BatchNorm default eps


def _round_up(x, m):
    return (x + m - 1) // m * m


# ---------------------------------------------------------------------------
# Fused conv chain + per-group max:
#   for each group g (= one (b, t) slot) and each tile of tm points:
#     w1e = trans[g] @ W1                      (3x3 fold, VPU broadcast MACs)
#     h1  = relu( (x @ w1e) * s1 + b1 )        (3 -> 64,   VPU)
#     h2  = relu( (h1 @ W2) * s2 + b2 )        (64 -> 128, MXU)
#     h3  =       (h2 @ W3) * s3 + b3 [relu]   (128 -> 1024, MXU)
#     out[g] = max(out[g], max_over_points(h3))   (accumulated in VMEM)
# ---------------------------------------------------------------------------
def _conv_chain_kernel(xyz_ref, tr_ref, w1_ref, s1_ref, b1_ref,
                       w2_ref, s2_ref, b2_ref, w3_ref, s3_ref, b3_ref,
                       o_ref, *, relu3, n_valid, tm):
    m = pl.program_id(1)

    # Fold the (per-group) 3x3 point transform into the first-layer weight.
    tr = tr_ref[0]                       # (3, 3)
    w1 = w1_ref[...]                     # (3, 64)
    w1e = (tr[:, 0:1] * w1[0:1, :] +
           tr[:, 1:2] * w1[1:2, :] +
           tr[:, 2:3] * w1[2:3, :])      # (3, 64)

    # First layer: K=3, done as broadcast MACs on the VPU (no 128-padding).
    x = xyz_ref[0]                       # (tm, 3)
    h = (x[:, 0:1] * w1e[0:1, :] +
         x[:, 1:2] * w1e[1:2, :] +
         x[:, 2:3] * w1e[2:3, :])        # (tm, 64)
    h = jnp.maximum(h * s1_ref[...] + b1_ref[...], 0.0)

    h = jnp.dot(h, w2_ref[...], preferred_element_type=jnp.float32)
    h = jnp.maximum(h * s2_ref[...] + b2_ref[...], 0.0)

    h = jnp.dot(h, w3_ref[...], preferred_element_type=jnp.float32)
    h = h * s3_ref[...] + b3_ref[...]
    if relu3:
        h = jnp.maximum(h, 0.0)

    # Mask zero-padded point rows before the max (c3 of the feat branch has no
    # ReLU, so padded rows would otherwise contribute `shift` to the max).
    row = m * tm + jax.lax.broadcasted_iota(jnp.int32, (tm, 1), 0)
    h = jnp.where(row < n_valid, h, -jnp.inf)
    tile_max = jnp.max(h, axis=0, keepdims=True)     # (1, 1024)

    @pl.when(m == 0)
    def _():
        o_ref[0] = tile_max

    @pl.when(m != 0)
    def _():
        o_ref[0] = jnp.maximum(o_ref[0], tile_max)


def conv_chain_max(xyz, trans, c1, c2, c3, *, relu3, tm_target=512):
    """xyz: (G, n, 3); trans: (1 or G, 3, 3).  Returns per-group max (G, C3)."""
    w1, s1, b1 = c1
    w2, s2, b2 = c2
    w3, s3, b3 = c3
    G, n, _ = xyz.shape
    tm = min(tm_target, _round_up(n, 8))       # points-tile, multiple of 8
    n_pad = _round_up(n, tm)
    if n_pad != n:
        xyz = jnp.pad(xyz, ((0, 0), (0, n_pad - n), (0, 0)))
    per_group_tr = trans.shape[0] > 1
    tr_map = (lambda g, m: (g, 0, 0)) if per_group_tr else (lambda g, m: (0, 0, 0))
    C1 = w1.shape[1]
    C2 = w2.shape[1]
    C3 = w3.shape[1]

    out = pl.pallas_call(
        functools.partial(_conv_chain_kernel, relu3=relu3, n_valid=n, tm=tm),
        out_shape=jax.ShapeDtypeStruct((G, 1, C3), jnp.float32),
        grid=(G, n_pad // tm),
        in_specs=[
            pl.BlockSpec((1, tm, 3), lambda g, m: (g, m, 0)),
            pl.BlockSpec((1, 3, 3), tr_map),
            pl.BlockSpec((3, C1), lambda g, m: (0, 0)),
            pl.BlockSpec((1, C1), lambda g, m: (0, 0)),
            pl.BlockSpec((1, C1), lambda g, m: (0, 0)),
            pl.BlockSpec((C1, C2), lambda g, m: (0, 0)),
            pl.BlockSpec((1, C2), lambda g, m: (0, 0)),
            pl.BlockSpec((1, C2), lambda g, m: (0, 0)),
            pl.BlockSpec((C2, C3), lambda g, m: (0, 0)),
            pl.BlockSpec((1, C3), lambda g, m: (0, 0)),
            pl.BlockSpec((1, C3), lambda g, m: (0, 0)),
        ],
        out_specs=pl.BlockSpec((1, 1, C3), lambda g, m: (g, 0, 0)),
        compiler_params=pltpu.CompilerParams(
            dimension_semantics=("parallel", "arbitrary")),
    )(xyz, trans, w1, s1, b1, w2, s2, b2, w3, s3, b3)
    return out.reshape(G, C3)


# ---------------------------------------------------------------------------
# Fused FC heads (M = b*t is tiny -> single launch, everything VMEM-resident).
# ---------------------------------------------------------------------------
def _stn_head_kernel(x_ref, w1_ref, s1_ref, b1_ref, w2_ref, s2_ref, b2_ref,
                     w3_ref, b3_ref, o_ref):
    h = jnp.dot(x_ref[...], w1_ref[...], preferred_element_type=jnp.float32)
    h = jnp.maximum(h * s1_ref[...] + b1_ref[...], 0.0)
    h = jnp.dot(h, w2_ref[...], preferred_element_type=jnp.float32)
    h = jnp.maximum(h * s2_ref[...] + b2_ref[...], 0.0)
    y = jnp.dot(h, w3_ref[...], preferred_element_type=jnp.float32) + b3_ref[...]
    # add the flattened 3x3 identity (positions 0, 4, 8)
    idx = jax.lax.broadcasted_iota(jnp.int32, y.shape, 1)
    iden = ((idx == 0) | (idx == 4) | (idx == 8)).astype(jnp.float32)
    o_ref[...] = y + iden


def _cls_head_kernel(x_ref, w1_ref, s1_ref, b1_ref, w2_ref, s2_ref, b2_ref,
                     w3_ref, b3_ref, o_ref):
    h = jnp.dot(x_ref[...], w1_ref[...], preferred_element_type=jnp.float32)
    h = jnp.maximum(h * s1_ref[...] + b1_ref[...], 0.0)
    # TODO(synk): nn.Dropout(p=0.3) is stochastic in train mode; eval-mode
    # (identity) semantics are implemented here.
    h = jnp.dot(h, w2_ref[...], preferred_element_type=jnp.float32)
    h = jnp.maximum(h * s2_ref[...] + b2_ref[...], 0.0)
    y = jnp.dot(h, w3_ref[...], preferred_element_type=jnp.float32) + b3_ref[...]
    mx = jnp.max(y, axis=-1, keepdims=True)
    s = y - mx
    lse = jnp.log(jnp.sum(jnp.exp(s), axis=-1, keepdims=True))
    o_ref[...] = s - lse


def _fc_head(kernel, x, f1, f2, f3, out_dim):
    G = x.shape[0]
    return pl.pallas_call(
        kernel,
        out_shape=jax.ShapeDtypeStruct((G, out_dim), jnp.float32),
    )(x, f1[0], f1[1], f1[2], f2[0], f2[1], f2[2], f3[0], f3[1])


# ---------------------------------------------------------------------------
# Deterministic parameter init (shapes follow the PyTorch __init__).
# BatchNorm (eval mode) folded into (scale, shift), already shaped (1, C).
# ---------------------------------------------------------------------------
def _init_linear(key, in_f, out_f):
    k1, k2 = jax.random.split(key)
    w = jax.random.normal(k1, (in_f, out_f), jnp.float32) / np.sqrt(in_f)
    b = 0.01 * jax.random.normal(k2, (out_f,), jnp.float32)
    return w, b


def _init_bn(key, c):
    k1, k2, k3, k4 = jax.random.split(key, 4)
    gamma = 1.0 + 0.1 * jax.random.normal(k1, (c,), jnp.float32)
    beta = 0.1 * jax.random.normal(k2, (c,), jnp.float32)
    mean = 0.1 * jax.random.normal(k3, (c,), jnp.float32)
    var = 0.9 + 0.2 * jax.random.uniform(k4, (c,), jnp.float32)
    return gamma, beta, mean, var


def _layer_bn(key, in_f, out_f):
    k1, k2 = jax.random.split(key)
    w, b = _init_linear(k1, in_f, out_f)
    gamma, beta, mean, var = _init_bn(k2, out_f)
    s = gamma / jnp.sqrt(var + EPS)
    shift = (b - mean) * s + beta
    return (w, s.reshape(1, -1), shift.reshape(1, -1))


def _layer_plain(key, in_f, out_f):
    w, b = _init_linear(key, in_f, out_f)
    return (w, b.reshape(1, -1))


def init_params(key, num_class=10, in_d=3):
    ks = jax.random.split(key, 12)
    stn = {
        "c1": _layer_bn(ks[0], 3, 64),
        "c2": _layer_bn(ks[1], 64, 128),
        "c3": _layer_bn(ks[2], 128, 1024),
        "f1": _layer_bn(ks[3], 1024, 512),
        "f2": _layer_bn(ks[4], 512, 256),
        "f3": _layer_plain(ks[5], 256, 9),
    }
    feat = {
        "c1": _layer_bn(ks[6], in_d, 64),
        "c2": _layer_bn(ks[7], 64, 128),
        "c3": _layer_bn(ks[8], 128, 1024),
    }
    cls = {
        "f1": _layer_bn(ks[9], 1024, 512),
        "f2": _layer_bn(ks[10], 512, 256),
        "f3": _layer_plain(ks[11], 256, num_class),
    }
    return {"stn": stn, "feat": feat, "cls": cls}


# ---------------------------------------------------------------------------
# Forward pass (PointNetCls, global_feat=True, feature_transform=False, in_d=3)
# ---------------------------------------------------------------------------
def pointnet_cls_forward(x, params):
    b, k, t, n = x.shape              # NCHW: (batch, channels=in_d, t, n_points)
    G = b * t
    # channels-last grouped points: (b*t, n, 3)
    xyz = jnp.transpose(x[:, 0:3], (0, 2, 3, 1)).reshape(G, n, 3)
    # TODO(synk): in_d > 3 (extra per-point features concatenated after the
    # transform) is not implemented; module default in_d=3 is covered.

    # ---- STN3d: fused conv chain + per-group max, then fused FC head ----
    p = params["stn"]
    ident = jnp.eye(3, dtype=jnp.float32).reshape(1, 3, 3)
    g = conv_chain_max(xyz, ident, p["c1"], p["c2"], p["c3"], relu3=True)
    t9 = _fc_head(_stn_head_kernel, g, p["f1"], p["f2"], p["f3"], 9)
    trans = t9.reshape(G, 3, 3)

    # ---- PointNetfeat: 3x3 transform folded into c1 inside the kernel ----
    p = params["feat"]
    feat = conv_chain_max(xyz, trans, p["c1"], p["c2"], p["c3"], relu3=False)
    trans_feat = None                  # feature_transform=False

    # ---- classification head (+ fused log_softmax) ----
    p = params["cls"]
    num_class = p["f3"][0].shape[1]
    logp = _fc_head(_cls_head_kernel, feat, p["f1"], p["f2"], p["f3"], num_class)
    return logp, trans, trans_feat


# ---------------------------------------------------------------------------
# Pure-JAX reference of the same math (sanity check only).
# ---------------------------------------------------------------------------
def _reference_forward(x, params):
    hp = jax.lax.Precision.HIGHEST
    b, k, t, n = x.shape
    G = b * t
    xyz = jnp.transpose(x[:, 0:3], (0, 2, 3, 1)).reshape(G, n, 3)

    def chain(pts, p, relu3):
        w1, s1, b1 = p["c1"]; w2, s2, b2 = p["c2"]; w3, s3, b3 = p["c3"]
        h = jnp.maximum(jnp.einsum("gnc,cd->gnd", pts, w1, precision=hp) * s1 + b1, 0.0)
        h = jnp.maximum(jnp.einsum("gnc,cd->gnd", h, w2, precision=hp) * s2 + b2, 0.0)
        h = jnp.einsum("gnc,cd->gnd", h, w3, precision=hp) * s3 + b3
        if relu3:
            h = jnp.maximum(h, 0.0)
        return jnp.max(h, axis=1)

    def head(f, p):
        w1, s1, b1 = p["f1"]; w2, s2, b2 = p["f2"]; w3, b3 = p["f3"]
        h = jnp.maximum(jnp.dot(f, w1, precision=hp) * s1 + b1, 0.0)
        h = jnp.maximum(jnp.dot(h, w2, precision=hp) * s2 + b2, 0.0)
        return jnp.dot(h, w3, precision=hp) + b3

    g = chain(xyz, params["stn"], True)
    trans = (head(g, params["stn"])
             + jnp.eye(3, dtype=jnp.float32).reshape(1, 9)).reshape(G, 3, 3)
    pts_t = jnp.einsum("gnc,gcd->gnd", xyz, trans, precision=hp)
    feat = chain(pts_t, params["feat"], False)
    logits = head(feat, params["cls"])
    return jax.nn.log_softmax(logits, axis=1), trans


if __name__ == "__main__":
    b, in_d, t, n = 2, 3, 4, 16
    num_class = 10

    key = jax.random.PRNGKey(0)
    kx, kp = jax.random.split(key)
    x = jax.random.normal(kx, (b, in_d, t, n), jnp.float32)
    params = init_params(kp, num_class=num_class, in_d=in_d)

    logp, trans, trans_feat = pointnet_cls_forward(x, params)
    jax.block_until_ready((logp, trans))

    assert logp.shape == (b * t, num_class)
    assert trans.shape == (b * t, 3, 3)
    assert trans_feat is None
    # log_softmax rows must sum to 1 in prob space
    assert bool(jnp.all(jnp.abs(jnp.sum(jnp.exp(logp), axis=1) - 1.0) < 1e-4))

    # cross-check against the pure-JAX reference
    logp_ref, trans_ref = _reference_forward(x, params)

    def _relerr(a, ref):
        return float(jnp.max(jnp.abs(a - ref)) / (jnp.max(jnp.abs(ref)) + 1e-6))

    assert _relerr(trans, trans_ref) < 5e-2, _relerr(trans, trans_ref)
    assert _relerr(logp, logp_ref) < 5e-2, _relerr(logp, logp_ref)
    print("KERNEL_OK")
</pallas_src>

<mosaic_0001>
module attributes {stable_mosaic.version = 11 : i64} {
  func.func @_conv_chain_kernel(%arg0: i32, %arg1: i32, %arg2: memref<1x16x3xf32, #tpu.memory_space<vmem>>, %arg3: memref<1x3x3xf32, #tpu.memory_space<vmem>>, %arg4: memref<3x64xf32, #tpu.memory_space<vmem>>, %arg5: memref<1x64xf32, #tpu.memory_space<vmem>>, %arg6: memref<1x64xf32, #tpu.memory_space<vmem>>, %arg7: memref<64x128xf32, #tpu.memory_space<vmem>>, %arg8: memref<1x128xf32, #tpu.memory_space<vmem>>, %arg9: memref<1x128xf32, #tpu.memory_space<vmem>>, %arg10: memref<128x1024xf32, #tpu.memory_space<vmem>>, %arg11: memref<1x1024xf32, #tpu.memory_space<vmem>>, %arg12: memref<1x1024xf32, #tpu.memory_space<vmem>>, %arg13: memref<1x1x1024xf32, #tpu.memory_space<vmem>>) attributes {dimension_semantics = [#tpu.dimension_semantics<parallel>, #tpu.dimension_semantics<arbitrary>], iteration_bounds = array<i64: 8, 1>, scalar_prefetch = 0 : i64, scratch_operands = 0 : i64, tpu.core_type = #tpu.core_type<tc>, window_params = [{transform_indices = @transform_0, window_bounds = array<i64: 1, 16, 3>}, {pipeline_mode = #tpu.pipeline_mode<synchronous>, transform_indices = @transform_1, window_bounds = array<i64: 1, 3, 3>}, {pipeline_mode = #tpu.pipeline_mode<synchronous>, transform_indices = @transform_2, window_bounds = array<i64: 3, 64>}, {pipeline_mode = #tpu.pipeline_mode<synchronous>, transform_indices = @transform_3, window_bounds = array<i64: 1, 64>}, {pipeline_mode = #tpu.pipeline_mode<synchronous>, transform_indices = @transform_4, window_bounds = array<i64: 1, 64>}, {pipeline_mode = #tpu.pipeline_mode<synchronous>, transform_indices = @transform_5, window_bounds = array<i64: 64, 128>}, {pipeline_mode = #tpu.pipeline_mode<synchronous>, transform_indices = @transform_6, window_bounds = array<i64: 1, 128>}, {pipeline_mode = #tpu.pipeline_mode<synchronous>, transform_indices = @transform_7, window_bounds = array<i64: 1, 128>}, {pipeline_mode = #tpu.pipeline_mode<synchronous>, transform_indices = @transform_8, window_bounds = array<i64: 128, 1024>}, {pipeline_mode = #tpu.pipeline_mode<synchronous>, transform_indices = @transform_9, window_bounds = array<i64: 1, 1024>}, {pipeline_mode = #tpu.pipeline_mode<synchronous>, transform_indices = @transform_10, window_bounds = array<i64: 1, 1024>}, {transform_indices = @transform_11, window_bounds = array<i64: 1, 1, 1024>}]} {
    %c0 = arith.constant 0 : index
    %c0_0 = arith.constant 0 : index
    %c0_1 = arith.constant 0 : index
    %0 = vector.load %arg3[%c0, %c0_0, %c0_1] : memref<1x3x3xf32, #tpu.memory_space<vmem>>, vector<1x3x3xf32>
    %1 = vector.shape_cast %0 : vector<1x3x3xf32> to vector<3x3xf32>
    %c0_2 = arith.constant 0 : index
    %c0_3 = arith.constant 0 : index
    %2 = vector.load %arg4[%c0_2, %c0_3] : memref<3x64xf32, #tpu.memory_space<vmem>>, vector<3x64xf32>
    %3 = vector.extract_strided_slice %1 {offsets = [0, 0], sizes = [3, 1], strides = [1, 1]} : vector<3x3xf32> to vector<3x1xf32>
    %4 = vector.extract_strided_slice %2 {offsets = [0, 0], sizes = [1, 64], strides = [1, 1]} : vector<3x64xf32> to vector<1x64xf32>
    %5 = vector.broadcast %3 : vector<3x1xf32> to vector<3x64xf32>
    %6 = vector.broadcast %4 : vector<1x64xf32> to vector<3x64xf32>
    %7 = arith.mulf %5, %6 : vector<3x64xf32>
    %8 = vector.extract_strided_slice %1 {offsets = [0, 1], sizes = [3, 1], strides = [1, 1]} : vector<3x3xf32> to vector<3x1xf32>
    %9 = vector.extract_strided_slice %2 {offsets = [1, 0], sizes = [1, 64], strides = [1, 1]} : vector<3x64xf32> to vector<1x64xf32>
    %10 = vector.broadcast %8 : vector<3x1xf32> to vector<3x64xf32>
    %11 = vector.broadcast %9 : vector<1x64xf32> to vector<3x64xf32>
    %12 = arith.mulf %10, %11 : vector<3x64xf32>
    %13 = arith.addf %7, %12 : vector<3x64xf32>
    %14 = vector.extract_strided_slice %1 {offsets = [0, 2], sizes = [3, 1], strides = [1, 1]} : vector<3x3xf32> to vector<3x1xf32>
    %15 = vector.extract_strided_slice %2 {offsets = [2, 0], sizes = [1, 64], strides = [1, 1]} : vector<3x64xf32> to vector<1x64xf32>
    %16 = vector.broadcast %14 : vector<3x1xf32> to vector<3x64xf32>
    %17 = vector.broadcast %15 : vector<1x64xf32> to vector<3x64xf32>
    %18 = arith.mulf %16, %17 : vector<3x64xf32>
    %19 = arith.addf %13, %18 : vector<3x64xf32>
    %c0_4 = arith.constant 0 : index
    %c0_5 = arith.constant 0 : index
    %c0_6 = arith.constant 0 : index
    %20 = vector.load %arg2[%c0_4, %c0_5, %c0_6] : memref<1x16x3xf32, #tpu.memory_space<vmem>>, vector<1x16x3xf32>
    %21 = vector.shape_cast %20 : vector<1x16x3xf32> to vector<16x3xf32>
    %22 = vector.extract_strided_slice %21 {offsets = [0, 0], sizes = [16, 1], strides = [1, 1]} : vector<16x3xf32> to vector<16x1xf32>
    %23 = vector.extract_strided_slice %19 {offsets = [0, 0], sizes = [1, 64], strides = [1, 1]} : vector<3x64xf32> to vector<1x64xf32>
    %24 = vector.broadcast %22 : vector<16x1xf32> to vector<16x64xf32>
    %25 = vector.broadcast %23 : vector<1x64xf32> to vector<16x64xf32>
    %26 = arith.mulf %24, %25 : vector<16x64xf32>
    %27 = vector.extract_strided_slice %21 {offsets = [0, 1], sizes = [16, 1], strides = [1, 1]} : vector<16x3xf32> to vector<16x1xf32>
    %28 = vector.extract_strided_slice %19 {offsets = [1, 0], sizes = [1, 64], strides = [1, 1]} : vector<3x64xf32> to vector<1x64xf32>
    %29 = vector.broadcast %27 : vector<16x1xf32> to vector<16x64xf32>
    %30 = vector.broadcast %28 : vector<1x64xf32> to vector<16x64xf32>
    %31 = arith.mulf %29, %30 : vector<16x64xf32>
    %32 = arith.addf %26, %31 : vector<16x64xf32>
    %33 = vector.extract_strided_slice %21 {offsets = [0, 2], sizes = [16, 1], strides = [1, 1]} : vector<16x3xf32> to vector<16x1xf32>
    %34 = vector.extract_strided_slice %19 {offsets = [2, 0], sizes = [1, 64], strides = [1, 1]} : vector<3x64xf32> to vector<1x64xf32>
    %35 = vector.broadcast %33 : vector<16x1xf32> to vector<16x64xf32>
    %36 = vector.broadcast %34 : vector<1x64xf32> to vector<16x64xf32>
    %37 = arith.mulf %35, %36 : vector<16x64xf32>
    %38 = arith.addf %32, %37 : vector<16x64xf32>
    %c0_7 = arith.constant 0 : index
    %c0_8 = arith.constant 0 : index
    %39 = vector.load %arg5[%c0_7, %c0_8] : memref<1x64xf32, #tpu.memory_space<vmem>>, vector<1x64xf32>
    %40 = vector.broadcast %39 : vector<1x64xf32> to vector<16x64xf32>
    %41 = arith.mulf %38, %40 : vector<16x64xf32>
    %c0_9 = arith.constant 0 : index
    %c0_10 = arith.constant 0 : index
    %42 = vector.load %arg6[%c0_9, %c0_10] : memref<1x64xf32, #tpu.memory_space<vmem>>, vector<1x64xf32>
    %43 = vector.broadcast %42 : vector<1x64xf32> to vector<16x64xf32>
    %44 = arith.addf %41, %43 : vector<16x64xf32>
    %cst = arith.constant 0.000000e+00 : f32
    %45 = vector.broadcast %cst : f32 to vector<16x64xf32>
    %46 = arith.maximumf %44, %45 : vector<16x64xf32>
    %c0_11 = arith.constant 0 : index
    %c0_12 = arith.constant 0 : index
    %47 = vector.load %arg7[%c0_11, %c0_12] : memref<64x128xf32, #tpu.memory_space<vmem>>, vector<64x128xf32>
    %cst_13 = arith.constant dense<0.000000e+00> : vector<16x128xf32>
    %48 = tpu.matmul %46, %47, %cst_13 {dimension_numbers = #tpu.dot_dimension_numbers<[1], [0], [0], [1], [0, 0, 1, 1], [], []>} : vector<16x64xf32>, vector<64x128xf32>, vector<16x128xf32> -> vector<16x128xf32>
    %c0_14 = arith.constant 0 : index
    %c0_15 = arith.constant 0 : index
    %49 = vector.load %arg8[%c0_14, %c0_15] : memref<1x128xf32, #tpu.memory_space<vmem>>, vector<1x128xf32>
    %50 = vector.broadcast %49 : vector<1x128xf32> to vector<16x128xf32>
    %51 = arith.mulf %48, %50 : vector<16x128xf32>
    %c0_16 = arith.constant 0 : index
    %c0_17 = arith.constant 0 : index
    %52 = vector.load %arg9[%c0_16, %c0_17] : memref<1x128xf32, #tpu.memory_space<vmem>>, vector<1x128xf32>
    %53 = vector.broadcast %52 : vector<1x128xf32> to vector<16x128xf32>
    %54 = arith.addf %51, %53 : vector<16x128xf32>
    %cst_18 = arith.constant 0.000000e+00 : f32
    %55 = vector.broadcast %cst_18 : f32 to vector<16x128xf32>
    %56 = arith.maximumf %54, %55 : vector<16x128xf32>
    %c0_19 = arith.constant 0 : index
    %c0_20 = arith.constant 0 : index
    %57 = vector.load %arg10[%c0_19, %c0_20] : memref<128x1024xf32, #tpu.memory_space<vmem>>, vector<128x1024xf32>
    %cst_21 = arith.constant dense<0.000000e+00> : vector<16x1024xf32>
    %58 = tpu.matmul %56, %57, %cst_21 {dimension_numbers = #tpu.dot_dimension_numbers<[1], [0], [0], [1], [0, 0, 1, 1], [], []>} : vector<16x128xf32>, vector<128x1024xf32>, vector<16x1024xf32> -> vector<16x1024xf32>
    %c0_22 = arith.constant 0 : index
    %c0_23 = arith.constant 0 : index
    %59 = vector.load %arg11[%c0_22, %c0_23] : memref<1x1024xf32, #tpu.memory_space<vmem>>, vector<1x1024xf32>
    %60 = vector.broadcast %59 : vector<1x1024xf32> to vector<16x1024xf32>
    %61 = arith.mulf %58, %60 : vector<16x1024xf32>
    %c0_24 = arith.constant 0 : index
    %c0_25 = arith.constant 0 : index
    %62 = vector.load %arg12[%c0_24, %c0_25] : memref<1x1024xf32, #tpu.memory_space<vmem>>, vector<1x1024xf32>
    %63 = vector.broadcast %62 : vector<1x1024xf32> to vector<16x1024xf32>
    %64 = arith.addf %61, %63 : vector<16x1024xf32>
    %cst_26 = arith.constant 0.000000e+00 : f32
    %65 = vector.broadcast %cst_26 : f32 to vector<16x1024xf32>
    %66 = arith.maximumf %64, %65 : vector<16x1024xf32>
    %c16_i32 = arith.constant 16 : i32
    %67 = arith.muli %arg1, %c16_i32 : i32
    %68 = tpu.iota {dimensions = array<i32: 0>} : vector<16x1xi32>
    %69 = vector.broadcast %67 : i32 to vector<16x1xi32>
    %70 = arith.addi %69, %68 : vector<16x1xi32>
    %c16_i32_27 = arith.constant 16 : i32
    %71 = vector.broadcast %c16_i32_27 : i32 to vector<16x1xi32>
    %72 = arith.cmpi slt, %70, %71 : vector<16x1xi32>
    %cst_28 = arith.constant 0xFF800000 : f32
    %73 = vector.shape_cast %72 : vector<16x1xi1> to vector<16x1xi1>
    %74 = vector.broadcast %73 : vector<16x1xi1> to vector<16x1024xi1>
    %75 = vector.broadcast %cst_28 : f32 to vector<16x1024xf32>
    %76 = arith.select %74, %66, %75 : vector<16x1024xi1>, vector<16x1024xf32>
    %cst_29 = arith.constant dense<0xFF800000> : vector<1024xf32>
    %77 = vector.multi_reduction <maximumf>, %76, %cst_29 [0] : vector<16x1024xf32> to vector<1024xf32>
    %78 = vector.shape_cast %77 : vector<1024xf32> to vector<1x1024xf32>
    %c0_i32 = arith.constant 0 : i32
    %79 = arith.cmpi eq, %arg1, %c0_i32 : i32
    %80 = arith.extui %79 : i1 to i32
    %c0_i32_30 = arith.constant 0 : i32
    %81 = arith.cmpi ne, %80, %c0_i32_30 : i32
    scf.if %81 {
      %c0_33 = arith.constant 0 : index
      %c0_34 = arith.constant 0 : index
      %c0_35 = arith.constant 0 : index
      %85 = vector.load %arg13[%c0_33, %c0_34, %c0_35] : memref<1x1x1024xf32, #tpu.memory_space<vmem>>, vector<1x1x1024xf32>
      %86 = vector.shape_cast %85 : vector<1x1x1024xf32> to vector<1x1024xf32>
      %87 = vector.shape_cast %78 : vector<1x1024xf32> to vector<1x1x1024xf32>
      tpu.vector_store %arg13[%c0_33, %c0_34, %c0_35], %87 {strides = array<i32>} : memref<1x1x1024xf32, #tpu.memory_space<vmem>>, vector<1x1x1024xf32>,
    } else {
    }
    %c0_i32_31 = arith.constant 0 : i32
    %82 = arith.cmpi ne, %arg1, %c0_i32_31 : i32
    %83 = arith.extui %82 : i1 to i32
    %c0_i32_32 = arith.constant 0 : i32
    %84 = arith.cmpi ne, %83, %c0_i32_32 : i32
    scf.if %84 {
      %c0_33 = arith.constant 0 : index
      %c0_34 = arith.constant 0 : index
      %c0_35 = arith.constant 0 : index
      %85 = vector.load %arg13[%c0_33, %c0_34, %c0_35] : memref<1x1x1024xf32, #tpu.memory_space<vmem>>, vector<1x1x1024xf32>
      %86 = vector.shape_cast %85 : vector<1x1x1024xf32> to vector<1x1024xf32>
      %87 = arith.maximumf %86, %78 : vector<1x1024xf32>
      %c0_36 = arith.constant 0 : index
      %c0_37 = arith.constant 0 : index
      %c0_38 = arith.constant 0 : index
      %88 = vector.load %arg13[%c0_36, %c0_37, %c0_38] : memref<1x1x1024xf32, #tpu.memory_space<vmem>>, vector<1x1x1024xf32>
      %89 = vector.shape_cast %88 : vector<1x1x1024xf32> to vector<1x1024xf32>
      %90 = vector.shape_cast %87 : vector<1x1024xf32> to vector<1x1x1024xf32>
      tpu.vector_store %arg13[%c0_36, %c0_37, %c0_38], %90 {strides = array<i32>} : memref<1x1x1024xf32, #tpu.memory_space<vmem>>, vector<1x1x1024xf32>,
    } else {
    }
    return
  }
  func.func @transform_0(%arg0: i32, %arg1: i32) -> (i32, i32, i32) {
    %c0_i32 = arith.constant 0 : i32
    %c0_i32_0 = arith.constant 0 : i32
    return %arg0, %arg1, %c0_i32 : i32, i32, i32
  }
  func.func @transform_1(%arg0: i32, %arg1: i32) -> (i32, i32, i32) {
    %c0_i32 = arith.constant 0 : i32
    %c0_i32_0 = arith.constant 0 : i32
    %c0_i32_1 = arith.constant 0 : i32
    %c0_i32_2 = arith.constant 0 : i32
    return %c0_i32, %c0_i32_0, %c0_i32_1 : i32, i32, i32
  }
  func.func @transform_2(%arg0: i32, %arg1: i32) -> (i32, i32) {
    %c0_i32 = arith.constant 0 : i32
    %c0_i32_0 = arith.constant 0 : i32
    %c0_i32_1 = arith.constant 0 : i32
    return %c0_i32, %c0_i32_0 : i32, i32
  }
  func.func @transform_3(%arg0: i32, %arg1: i32) -> (i32, i32) {
    %c0_i32 = arith.constant 0 : i32
    %c0_i32_0 = arith.constant 0 : i32
    %c0_i32_1 = arith.constant 0 : i32
    return %c0_i32, %c0_i32_0 : i32, i32
  }
  func.func @transform_4(%arg0: i32, %arg1: i32) -> (i32, i32) {
    %c0_i32 = arith.constant 0 : i32
    %c0_i32_0 = arith.constant 0 : i32
    %c0_i32_1 = arith.constant 0 : i32
    return %c0_i32, %c0_i32_0 : i32, i32
  }
  func.func @transform_5(%arg0: i32, %arg1: i32) -> (i32, i32) {
    %c0_i32 = arith.constant 0 : i32
    %c0_i32_0 = arith.constant 0 : i32
    %c0_i32_1 = arith.constant 0 : i32
    return %c0_i32, %c0_i32_0 : i32, i32
  }
  func.func @transform_6(%arg0: i32, %arg1: i32) -> (i32, i32) {
    %c0_i32 = arith.constant 0 : i32
    %c0_i32_0 = arith.constant 0 : i32
    %c0_i32_1 = arith.constant 0 : i32
    return %c0_i32, %c0_i32_0 : i32, i32
  }
  func.func @transform_7(%arg0: i32, %arg1: i32) -> (i32, i32) {
    %c0_i32 = arith.constant 0 : i32
    %c0_i32_0 = arith.constant 0 : i32
    %c0_i32_1 = arith.constant 0 : i32
    return %c0_i32, %c0_i32_0 : i32, i32
  }
  func.func @transform_8(%arg0: i32, %arg1: i32) -> (i32, i32) {
    %c0_i32 = arith.constant 0 : i32
    %c0_i32_0 = arith.constant 0 : i32
    %c0_i32_1 = arith.constant 0 : i32
    return %c0_i32, %c0_i32_0 : i32, i32
  }
  func.func @transform_9(%arg0: i32, %arg1: i32) -> (i32, i32) {
    %c0_i32 = arith.constant 0 : i32
    %c0_i32_0 = arith.constant 0 : i32
    %c0_i32_1 = arith.constant 0 : i32
    return %c0_i32, %c0_i32_0 : i32, i32
  }
  func.func @transform_10(%arg0: i32, %arg1: i32) -> (i32, i32) {
    %c0_i32 = arith.constant 0 : i32
    %c0_i32_0 = arith.constant 0 : i32
    %c0_i32_1 = arith.constant 0 : i32
    return %c0_i32, %c0_i32_0 : i32, i32
  }
  func.func @transform_11(%arg0: i32, %arg1: i32) -> (i32, i32, i32) {
    %c0_i32 = arith.constant 0 : i32
    %c0_i32_0 = arith.constant 0 : i32
    %c0_i32_1 = arith.constant 0 : i32
    return %arg0, %c0_i32, %c0_i32_0 : i32, i32, i32
  }
}

</mosaic_0001>

<bundles_post_ra>
// kernel: tpu_custom_call.1
= control target key start
LH: loop header
LB: loop body
LE: loop exit
PB: predicated region body
PF: predicated region fallthrough
CT: control target
= control target key end

     0   :  { %s2048_s0 = inlined_call_operand.vmem [shape: f32[8,16,3], index: 0, kind: input, shape index: {}]   ;;  %s2049_s1 = inlined_call_operand.vmem [shape: f32[1,3,3], index: 1, kind: input, shape index: {}]   ;;  %s2050_s2 = inlined_call_operand.vmem [shape: f32[3,64], index: 2, kind: input, shape index: {}]   ;;  %s2051_s3 = inlined_call_operand.vmem [shape: f32[1,64], index: 3, kind: input, shape index: {}]   ;;  %s2052_s4 = inlined_call_operand.vmem [shape: f32[1,64], index: 4, kind: input, shape index: {}]   ;;  %s2053_s5 = inlined_call_operand.vmem [shape: f32[64,128], index: 5, kind: input, shape index: {}]   ;;  %s2054_s6 = inlined_call_operand.vmem [shape: f32[1,128], index: 6, kind: input, shape index: {}]   ;;  %s2055_s7 = inlined_call_operand.vmem [shape: f32[1,128], index: 7, kind: input, shape index: {}]   ;;  %s2056_s8 = inlined_call_operand.hbm [shape: f32[128,1024], index: 8, kind: input, shape index: {}]   ;;  %s2057_s9 = inlined_call_operand.vmem [shape: f32[1,1024], index: 9, kind: input, shape index: {}]   ;;  %s2058_s10 = inlined_call_operand.vmem [shape: f32[1,1024], index: 10, kind: input, shape index: {}]   ;;  %s2059_s11 = inlined_call_operand.hbm [shape: f32[8,1,1024], index: 11, kind: output, shape index: {}]  }
   0x1   :  { %2060 = sst [smem:[#allocation8_spill]] %s2048_s0 }
   0x2   :  { %2061 = sst [smem:[#allocation9_spill]] %s2049_s1 }
   0x3   :  { %2062 = sst [smem:[#allocation10_spill]] %s2050_s2 }
   0x4   :  { %16 = vsyncpa [#allocation3], 0 }
   0x5   :  { %17 = vsyncpa [#allocation4], 0 }
   0x6   :  { %19 = vsyncpa [#allocation4 + $0x1], 0  ;;  %s1831_s17 = smov 0   ;;  %s1833_s18 = smov 0  }
   0x7   :  { %s1835_s19 = smov 0   ;;  %s1837_s20 = smov 0  }
   0x8   :  { %s1839_s21 = smov 0   ;;  %s1841_s22 = smov 0  }
   0x9 LB: > { %s1521_s23 = sadd.s32 4294967295, %s1760_s22   ;;  %s1522_s24 = sadd.s32 4294967294, %s1760_s22   ;;  %s1760_s22 = sphi %s1841_s22, %s25_s22   ;;  %s1756_s21 = sphi %s1839_s21, %s2074_s21   ;;  %s1752_s20 = sphi %s1837_s20, %s2073_s20   ;;  %s1748_s19 = sphi %s1835_s19, %s2072_s19   ;;  %s1744_s18 = sphi %s1833_s18, %s2071_s18   ;;  %s1740_s17 = sphi %s1831_s17, %s2070_s17  }
   0xa   : > { %s37_s25 = sadd.s32 1, %s1756_s21  ;;  %s282_s26 = sadd.s32 1, %s1748_s19 }
   0xb   : > { %p39_p0 = scmp.ge.s32.totalorder %s37_s25, 8  ;;  %p292_p1 = scmp.ne.s32.totalorder %s1748_s19, %s1744_s18 }
   0xc   : > { %p293_p2 = scmp.eq.s32.totalorder %s1521_s23, 7  ;;  %p298_p3 = scmp.ne.s32.totalorder %s1744_s18, %s1740_s17 }
   0xd   : > { %s2076_s25 = smov (%p39_p0, %s37_s25), 0  ;;  %p299_p5 = scmp.eq.s32.totalorder %s1522_s24, 7 }
   0xe   : > { %p1871_p4 = por %p293_p2, %p292_p1  ;;  %s279_s28 = ssub.s32 %s1756_s21, %s2076_s25 }
   0xf   : > { %p1523_p6 = scmp.ge.s32.totalorder %s1760_s22, 1  ;;  %p280_p7 = scmp.eq.s32.totalorder %s279_s28, 0 }
  0x10   : > { %p1878_p8 = por %p299_p5, %p298_p3  ;;  %p306_p9 = scmp.lt.s32.totalorder %s1760_s22, 9 }
  0x11   : > { %s1884_s30 = scalar_select %p280_p7, %s1748_s19, %s282_s26  }
  0x12   : > { %p1886_p10 = pnand %p1523_p6, %p306_p9  ;;  %p1890_p11 = scmp.eq.s32.totalorder %s1521_s23, 0 }
  0x13   : > { %s1762_s14 = smov [#allocation2]  }
  0x14   : > { %p1579_p12 = pneg %p1886_p10  ;;  %s339_s15 = sshll.u32 %s1762_s14, 4  ;;  %s340_s15 = int_to_ptr.vmem [resolvable:$true] %s339_s15 }
  0x15   : > { %s1665_s16 = scalar_lea.vmem %s340_s15, 16384  ;;  %p1673_p5 = scmp.lt.s32.totalorder %s340_s15, %s340_s15 }
  0x16   : > { %p1580_p13 = pnand %p1890_p11, %p1579_p12  ;;  %p1666_p1 = scmp.ne.s32.totalorder %s340_s15, %s1665_s16 }
  0x17   : > { %p1674_p6 = scmp.lt.s32.totalorder %s1665_s16, %s1665_s16 }
  0x18   : > { %p1656_p0 = pneg %p1580_p13 }
  0x19   : > { %p1675_p7 = por %p1674_p6, %p1673_p5 }
  0x1a   : > { %p1668_p2 = pnand %p1666_p1, %p1656_p0 }
  0x1c   : > { %p1669_p3 = pneg %p1668_p2 }
  0x1e   : > { %p1676_p9 = pnand %p1675_p7, %p1669_p3 }
  0x20   : > { %1679 = shalt.err (!%p1676_p9)
}
  0x21   : > { %s1763_s23 = smov 1024   ;;  %s1764_s24 = smov 64  }
  0x22   : > { %1582 = dma.hbm_to_vmem [thread:$0]  (!%p1580_p13), %s2056_s8, 16384, %s340_s15, [#allocation3], %s1763_s23, %s1763_s23, %s1764_s24  }
  0x23   : > { %374 = sbr.rel (%p1886_p10) target bundleno = 680 (0x2a8), region = 64 }
  0x28   : > { %1731 = dma.done.wait (%p1890_p11), [#allocation3], 16384  }
  0x29   : > { %1733 = vsyncadd (%p1890_p11), [#allocation3], 4294950912  ;;  %p419_p12 = scmp.lt.s32.totalorder %s1752_s20, 7  ;;  %v1765_v0 = vmov 2   ;;  %v1766_v1 = vmov 0   ;;  %s2067_s1 = sld [smem:[#allocation9_spill]]  ;;  %v435_v39 = vlaneseq }
  0x2a   : > { %1648 = vset.pattern.permute.xlu1 %v1765_v0  ;;  %1646 = vset.pattern.permute.xlu0 %v1766_v1  ;;  %s2068_s0 = sld [smem:[#allocation8_spill]]  ;;  %v1767_v4 = vmov 1   ;;  %v537_v6 = vld [vmem:[%s2053_s5 + $0x38] sm:$0xff]  ;;  %v536_v7 = vld [vmem:[%s2053_s5 + $0x30] sm:$0xff]  ;;  %v535_v8 = vld [vmem:[%s2053_s5 + $0x28] sm:$0xff]  ;;  %vm538_vm0 = vcmask 523264  }
  0x2b   : > { %s420_s14 = scalar_select %p419_p12, %s1752_s20, 7  ;;  %1554 = vmatprep.subr.mxu0 %v537_v6  ;;  %v534_v9 = vld [vmem:[%s2053_s5 + $0x20] sm:$0xff]  ;;  %v533_v10 = vld [vmem:[%s2053_s5 + $0x18] sm:$0xff]  ;;  %v532_v11 = vld [vmem:[%s2053_s5 + $0x10] sm:$0xff]  ;;  %v1939_v40 = vshrl.u32 %v435_v39, 7 }
  0x2c   : > { %1555 = vmatpush3.msra.mxu0 %v537_v6  ;;  %v531_v12 = vld [vmem:[%s2053_s5 + $0x8] sm:$0xff]  ;;  %v530_v13 = vld [vmem:[%s2053_s5] sm:$0xff]  ;;  %v763_v15 = vld [vmem:[#allocation2 + $0x3d8] sm:$0xff]  ;;  %s2069_s2 = sld [smem:[#allocation10_spill]]  ;;  %s1543_s15 = sshll.u32 %s1752_s20, 7 }
  0x2d   : > { %s1542_s16 = sshll.u32 %s420_s14, 4  ;;  %1556 = vmatprep.subr.mxu0 %v536_v7  ;;  %v761_v14 = vld [vmem:[#allocation2 + $0x3c8] sm:$0xff]  ;;  %v760_v16 = vld [vmem:[#allocation2 + $0x3c0] sm:$0xff]  ;;  %v1942_v41 = vsub.s32 0, %v1939_v40  ;;  %v1945_v42 = vsub.s32 1, %v1939_v40  ;;  %v1951_v44 = vsub.s32 2, %v1939_v40  ;;  %s1434_s28 = scalar_lea.hbm %s2059_s11, %s1543_s15 }
  0x2e   : > { %1557 = vmatpush3.msra.mxu0 %v536_v7  ;;  %768 = vmatprep.subr.mxu1 %v761_v14  ;;  %v753_v17 = vld [vmem:[#allocation2 + $0x388] sm:$0xff]  ;;  %v752_v18 = vld [vmem:[#allocation2 + $0x380] sm:$0xff]  ;;  %v682_v39 = vld [vmem:[#allocation2 + $0x150] sm:$0xff] }
  0x2f   : > { %v428_v2 = vld [vmem:[%s2067_s1] sm:$0x7]  ;;  %1558 = vmatprep.subr.mxu0 %v535_v8  ;;  %769 = vmatpush1.msra.mxu1 %v760_v16  ;;  %v745_v19 = vld [vmem:[#allocation2 + $0x348] sm:$0xff]  ;;  %s1770_s1 = smov [#allocation5]  }
  0x30   : > { %s426_s24 = scalar_lea.vmem %s2068_s0, %s1542_s16  ;;  %451 = vperm.xlu1 %1648, %v428_v2   ;;  %432 = vperm.xlu0 %1646, %v428_v2   ;;  %v744_v20 = vld [vmem:[#allocation2 + $0x340] sm:$0xff]  ;;  %v737_v21 = vld [vmem:[#allocation2 + $0x308] sm:$0xff]  ;;  %s415_s16 = sand.u32 1, %s1744_s18  }
  0x31   : > { %v460_v3 = vld [vmem:[%s426_s24] sm:$0xff]  ;;  %v461_v5 = vld [vmem:[%s426_s24 + $0x8] sm:$0xff]  ;;  %1559 = vmatpush3.msra.mxu0 %v535_v8  ;;  %770 = vmatprep.subr.mxu1 %v753_v17  ;;  %s1528_s26 = sshll.u32 %s415_s16, 3  ;;  %s1422_s14 = scalar_lea.sflag [#allocation4], %s415_s16 }
  0x32   : > { %1560 = vmatprep.subr.mxu0 %v534_v9  ;;  %771 = vmatpush1.msra.mxu1 %v752_v18  ;;  %v736_v22 = vld [vmem:[#allocation2 + $0x300] sm:$0xff]  ;;  %v729_v23 = vld [vmem:[#allocation2 + $0x2c8] sm:$0xff]  ;;  %s417_s12 = scalar_lea.vmem [#allocation5], %s1528_s26 }
  0x33   : > { %1561 = vmatpush3.msra.mxu0 %v534_v9  ;;  %772 = vmatprep.subr.mxu1 %v745_v19  ;;  %v728_v24 = vld [vmem:[#allocation2 + $0x2c0] sm:$0xff]  ;;  %v721_v25 = vld [vmem:[#allocation2 + $0x288] sm:$0xff]  ;;  %v762_v19 = vld [vmem:[#allocation2 + $0x3d0] sm:$0xff]  ;;  %s1436_s23 = sshll.u32 %s417_s12, 4  ;;  %s1437_s23 = int_to_ptr.vmem [resolvable:$true] %s1436_s23 }
  0x34   : > { %1649 = vset.pattern.permute.xlu1 %v1766_v1  ;;  %1647 = vset.pattern.permute.xlu0 %v1767_v4  ;;  %v720_v26 = vld [vmem:[#allocation2 + $0x280] sm:$0xff]  ;;  %v713_v27 = vld [vmem:[#allocation2 + $0x248] sm:$0xff]  ;;  %s1680_s0 = scalar_lea.vmem %s1437_s23, 128 }
  0x35   : > { %464 = vperm.xlu1 %1649, %v460_v3   ;;  %441 = vperm.xlu0 %1647, %v428_v2   ;;  %v712_v28 = vld [vmem:[#allocation2 + $0x240] sm:$0xff]  ;;  %v705_v29 = vld [vmem:[#allocation2 + $0x208] sm:$0xff]  ;;  %p1681_p10 = scmp.ne.s32.totalorder %s1437_s23, %s1680_s0 }
  0x36   : > { %1562 = vmatprep.subr.mxu0 %v533_v10  ;;  %773 = vmatpush1.msra.mxu1 %v744_v20  ;;  %v704_v30 = vld [vmem:[#allocation2 + $0x200] sm:$0xff]  ;;  %v697_v31 = vld [vmem:[#allocation2 + $0x1c8] sm:$0xff]  ;;  %v755_v20 = vld [vmem:[#allocation2 + $0x398] sm:$0xff] }
  0x37   : > { %1563 = vmatpush3.msra.mxu0 %v533_v10  ;;  %774 = vmatprep.subr.mxu1 %v737_v21  ;;  %v696_v32 = vld [vmem:[#allocation2 + $0x1c0] sm:$0xff]  ;;  %v689_v33 = vld [vmem:[#allocation2 + $0x188] sm:$0xff]  ;;  %v754_v21 = vld [vmem:[#allocation2 + $0x390] sm:$0xff]  ;;  %p1682_p11 = pnand %p1681_p10, %p1871_p4 }
  0x38   : > { %1564 = vmatprep.subr.mxu0 %v532_v11  ;;  %775 = vmatpush1.msra.mxu1 %v736_v22  ;;  %v688_v34 = vld [vmem:[#allocation2 + $0x180] sm:$0xff]  ;;  %v681_v35 = vld [vmem:[#allocation2 + $0x148] sm:$0xff]  ;;  %v747_v22 = vld [vmem:[#allocation2 + $0x358] sm:$0xff] }
  0x39   : > { %1650 = vset.pattern.permute.xlu1 %v1767_v4  ;;  %1651 = vset.pattern.permute.xlu0 %v1766_v1  ;;  %v680_v36 = vld [vmem:[#allocation2 + $0x140] sm:$0xff]  ;;  %v673_v37 = vld [vmem:[#allocation2 + $0x108] sm:$0xff]  ;;  %p1683_p13 = pneg %p1682_p11 }
  0x3a   : > { %479 = vperm.xlu1 %1650, %v460_v3   ;;  %469 = vperm.xlu0 %1651, %v461_v5   ;;  %v672_v38 = vld [vmem:[#allocation2 + $0x100] sm:$0xff] }
  0x3b   : > { %1565 = vmatpush3.msra.mxu0 %v532_v11  ;;  %776 = vmatprep.subr.mxu1 %v729_v23  ;;  %v429_v43 = vld [vmem:[%s2069_s2] sm:$0x7]  ;;  %v746_v23 = vld [vmem:[#allocation2 + $0x350] sm:$0xff]  ;;  %s1684_s2 = sshll.u32 %s1770_s1, 4  ;;  %s1685_s2 = int_to_ptr.vmem [resolvable:$false] %s1684_s2 }
  0x3c   : > { %1566 = vmatprep.subr.mxu0 %v531_v12  ;;  %777 = vmatpush1.msra.mxu1 %v728_v24  ;;  %v438_v46 = vrot.slane %v429_v43, %v1942_v41  ;;  %v447_v48 = vrot.slane %v429_v43, %v1945_v42  ;;  %v457_v49 = vrot.slane %v429_v43, %v1951_v44  ;;  %v1531_v6 = vld [vmem:[%s2051_s3] ss:$0 sm:$0xff]  ;;  %v739_v24 = vld [vmem:[#allocation2 + $0x318] sm:$0xff]  ;;  %s1686_s20 = scalar_lea.vmem %s1685_s2, 256  ;;  %p1687_p0 = scmp.lt.s32.totalorder %s1437_s23, %s1685_s2 }
  0x3d   : > { %1567 = vmatpush3.msra.mxu0 %v531_v12  ;;  %778 = vmatprep.subr.mxu1 %v721_v25  ;;  %v738_v25 = vld [vmem:[#allocation2 + $0x310] sm:$0xff]  ;;  %v675_v43 = vld [vmem:[#allocation2 + $0x118] sm:$0xff]  ;;  %p1688_p1 = scmp.lt.s32.totalorder %s1686_s20, %s1680_s0 }
  0x3e   : > { %483 = vperm.xlu1 %1650, %v461_v5   ;;  %1653 = vset.pattern.permute.xlu0 %v1765_v0 }
  0x3f   : > { %499 = vperm.xlu0 %1653, %v461_v5   ;;  %1568 = vmatprep.subr.mxu0 %v530_v13  ;;  %p1689_p2 = por %p1688_p1, %p1687_p0 }
  0x40   : > { %1569 = vmatpush3.msra.mxu0 %v530_v13  ;;  %779 = vmatpush1.msra.mxu1 %v720_v26  ;;  %v1532_v13 = vld [vmem:[%s2052_s4] ss:$0 sm:$0xff]  ;;  %v731_v26 = vld [vmem:[#allocation2 + $0x2d8] sm:$0xff] }
  0x41   : > { %845 = vmatprep.subr.mxu0 %v763_v15  ;;  %780 = vmatprep.subr.mxu1 %v713_v27  ;;  %v730_v27 = vld [vmem:[#allocation2 + $0x2d0] sm:$0xff]  ;;  %p1690_p3 = pnand %p1689_p2, %p1683_p13 }
  0x42   : > { %1652 = vset.pattern.permute.xlu1 %v1765_v0  ;;  %781 = vmatpush1.msra.mxu1 %v712_v28  ;;  %v723_v28 = vld [vmem:[#allocation2 + $0x298] sm:$0xff] }
  0x43   : > { %495 = vperm.xlu1 %1652, %v460_v3   ;;  %782 = vmatprep.subr.mxu1 %v705_v29  ;;  %v722_v29 = vld [vmem:[#allocation2 + $0x290] sm:$0xff] }
  0x44   : > { %783 = vmatpush1.msra.mxu1 %v704_v30  ;;  %v715_v30 = vld [vmem:[#allocation2 + $0x258] sm:$0xff] }
  0x45   : > { %784 = vmatprep.subr.mxu1 %v697_v31  ;;  %v714_v31 = vld [vmem:[#allocation2 + $0x250] sm:$0xff] }
  0x46   : > { %785 = vmatpush1.msra.mxu1 %v696_v32  ;;  %v707_v32 = vld [vmem:[#allocation2 + $0x218] sm:$0xff] }
  0x47   : > { %786 = vmatprep.subr.mxu1 %v689_v33  ;;  %v706_v33 = vld [vmem:[#allocation2 + $0x210] sm:$0xff] }
  0x48   : > { %787 = vmatpush1.msra.mxu1 %v688_v34  ;;  %v699_v34 = vld [vmem:[#allocation2 + $0x1d8] sm:$0xff] }
  0x49   : > { %788 = vmatprep.subr.mxu1 %v681_v35  ;;  %v698_v35 = vld [vmem:[#allocation2 + $0x1d0] sm:$0xff] }
  0x4a   : > { %789 = vmatpush1.msra.mxu1 %v680_v36  ;;  %v691_v36 = vld [vmem:[#allocation2 + $0x198] sm:$0xff] }
  0x4b   : > { %790 = vmatprep.subr.mxu1 %v673_v37  ;;  %v690_v37 = vld [vmem:[#allocation2 + $0x190] sm:$0xff] }
  0x4c   : > { %791 = vmatpush1.msra.mxu1 %v672_v38  ;;  %v683_v38 = vld [vmem:[#allocation2 + $0x158] sm:$0xff] }
  0xab   : > { %v452_v45 = vpop.permute.xlu1 %451  ;;  %v433_v47 = vpop.permute.xlu0 %432 }
  0xac   : > { %v439_v50 = vmul.f32 %v438_v46, %v433_v47  ;;  %v458_v54 = vmul.f32 %v457_v49, %v452_v45  ;;  %v674_v45 = vld [vmem:[#allocation2 + $0x110] sm:$0xff]  ;;  %v665_v46 = vld [vmem:[#allocation2 + $0xc8] sm:$0xff]  ;;  %v667_v47 = vld [vmem:[#allocation2 + $0xd8] sm:$0xff] }
  0xad   : > { %792 = vmatprep.subr.mxu1 %v665_v46  ;;  %v666_v49 = vld [vmem:[#allocation2 + $0xd0] sm:$0xff]  ;;  %v703_v46 = vld [vmem:[#allocation2 + $0x1f8] sm:$0xff] }
  0xb0   : > { %v465_v51 = vpop.permute.xlu1 %464  ;;  %v442_v52 = vpop.permute.xlu0 %441 }
  0xb1   : > { %v448_v53 = vmul.f32 %v447_v48, %v442_v52  ;;  %v664_v48 = vld [vmem:[#allocation2 + $0xc0] sm:$0xff] }
  0xb2   : > { %793 = vmatpush1.msra.mxu1 %v664_v48  ;;  %v656_v52 = vld [vmem:[#allocation2 + $0x80] sm:$0xff]  ;;  %v702_v48 = vld [vmem:[#allocation2 + $0x1f0] sm:$0xff] }
  0xb3   : > { %v449_v55 = vadd.f32 %v448_v53, %v439_v50  ;;  %v657_v50 = vld [vmem:[#allocation2 + $0x88] sm:$0xff]  ;;  %v658_v53 = vld [vmem:[#allocation2 + $0x90] sm:$0xff] }
  0xb4   : > { %794 = vmatprep.subr.mxu1 %v657_v50  ;;  %v695_v50 = vld [vmem:[#allocation2 + $0x1b8] sm:$0xff] }
  0xb5   : > { %v459_v56 = vadd.f32 %v458_v54, %v449_v55  ;;  %v480_v57 = vpop.permute.xlu1 %479  ;;  %v470_v58 = vpop.permute.xlu0 %469  ;;  %795 = vmatpush1.msra.mxu1 %v656_v52  ;;  %v649_v54 = vld [vmem:[#allocation2 + $0x48] sm:$0xff]  ;;  %v651_v55 = vld [vmem:[#allocation2 + $0x58] sm:$0xff]  ;;  %v694_v52 = vld [vmem:[#allocation2 + $0x1b0] sm:$0xff] }
  0xb6   : > { %796 = vmatprep.subr.mxu1 %v649_v54  ;;  %v687_v54 = vld [vmem:[#allocation2 + $0x178] sm:$0xff] }
  0xb7   : > { %v475_v59 = vrot.slane %v459_v56, %v1942_v41  ;;  %v489_v60 = vrot.slane %v459_v56, %v1945_v42  ;;  %v505_v63 = vrot.slane %v459_v56, %v1951_v44  ;;  %v648_v56 = vld [vmem:[#allocation2 + $0x40] sm:$0xff] }
  0xb8   : > { %797 = vmatpush1.msra.mxu1 %v648_v56  ;;  %v686_v56 = vld [vmem:[#allocation2 + $0x170] sm:$0xff] }
  0xb9   : > { %v477_v61 = vmul.f32 %v475_v59, %v470_v58  ;;  %v484_v62 = vpop.permute.xlu1 %483  ;;  %v476_v2 = vmul.f32 %v475_v59, %v465_v51  ;;  %v490_v3 = vmul.f32 %v489_v60, %v480_v57  ;;  %v659_v51 = vld [vmem:[#allocation2 + $0x98] sm:$0xff]  ;;  %v650_v57 = vld [vmem:[#allocation2 + $0x50] sm:$0xff]  ;;  %v641_v58 = vld [vmem:[#allocation2 + $0x8] sm:$0xff] }
  0xba   : > { %v491_v0 = vmul.f32 %v489_v60, %v484_v62  ;;  %v500_v1 = vpop.permute.xlu0 %499  ;;  %v643_v59 = vld [vmem:[#allocation2 + $0x18] sm:$0xff]  ;;  %798 = vmatprep.subr.mxu1 %v641_v58  ;;  %v640_v60 = vld [vmem:[#allocation2] sm:$0xff]  ;;  %v765_v62 = vld [vmem:[#allocation2 + $0x3e8] sm:$0xff] }
  0xbb   : > { %v507_v4 = vmul.f32 %v505_v63, %v500_v1  ;;  %v492_v9 = vadd.f32 %v490_v3, %v476_v2  ;;  %799 = vmatpush1.msra.mxu1 %v640_v60  ;;  %v1535_v2 = vld [vmem:[%s2054_s6] ss:$0 sm:$0xff]  ;;  %v679_v58 = vld [vmem:[#allocation2 + $0x138] sm:$0xff]  ;;  %v678_v60 = vld [vmem:[#allocation2 + $0x130] sm:$0xff] }
  0xbc   : > { %v493_v5 = vadd.f32 %v491_v0, %v477_v61  ;;  %v642_v61 = vld [vmem:[#allocation2 + $0x10] sm:$0xff]  ;;  %v1768_v0 = vmov 0.0   ;;  %922 = vmatprep.subr.mxu1 %v765_v62  ;;  %v671_v62 = vld [vmem:[#allocation2 + $0xf8] sm:$0xff] }
  0xbd   : > { %832 = vmatprep.mubr.f32.mxu1 %v1768_v0 }
  0xbe   : > { %v509_v7 = vadd.f32 %v507_v4, %v493_v5  ;;  %v496_v8 = vpop.permute.xlu1 %495  ;;  %v1536_v5 = vld [vmem:[%s2055_s7] ss:$0 sm:$0xff] }
  0xbf   : > { %v506_v10 = vmul.f32 %v505_v63, %v496_v8  ;;  %v767_v63 = vld [vmem:[#allocation2 + $0x3f8] sm:$0xff] }
  0xc0   : > { %v518_v11 = vmul.f32 %v1531_v6, %v509_v7 }
  0xc1   : > { %v508_v12 = vadd.f32 %v506_v10, %v492_v9  ;;  %v764_v9 = vld [vmem:[#allocation2 + $0x3e0] sm:$0xff]  ;;  %v766_v10 = vld [vmem:[#allocation2 + $0x3f0] sm:$0xff] }
  0xc2   : > { %v527_v15 = vadd.f32 %v1532_v13, %v518_v11  ;;  %v757_v11 = vld [vmem:[#allocation2 + $0x3a8] sm:$0xff] }
  0xc3   : > { %v517_v14 = vmul.f32 %v1531_v6, %v508_v12  ;;  %v759_v12 = vld [vmem:[#allocation2 + $0x3b8] sm:$0xff] }
  0xc4   : > { %v529_v18 = vmax.f32 %v527_v15, 0.0  ;;  %v758_v15 = vld [vmem:[#allocation2 + $0x3b0] sm:$0xff] }
  0xc5   : > { %v526_v16 = vadd.f32 %v1532_v13, %v517_v14  ;;  %v756_v14 = vld [vmem:[#allocation2 + $0x3a0] sm:$0xff] }
  0xc7   : > { %v528_v17 = vmax.f32 %v526_v16, 0.0  ;;  %v749_v16 = vld [vmem:[#allocation2 + $0x368] sm:$0xff] }
  0xc9   : > { %1570 = vmatprep.mubr.msk.f32.mxu0 %vm538_vm0, %v528_v17  ;;  %v751_v17 = vld [vmem:[#allocation2 + $0x378] sm:$0xff] }
  0xca   : > { %1571 = vmatmul.mubr.msk.f32.vlgmr.msra.gmra.mxu0 %vm538_vm0, %v529_v18 }
  0xcb   : > { %846 = vmatpush1.msra.mxu0 %v762_v19  ;;  %909 = vmatprep.mubr.f32.mxu0 %v1768_v0  ;;  %v748_v19 = vld [vmem:[#allocation2 + $0x360] sm:$0xff] }
  0xcc   : > { %847 = vmatprep.subr.mxu0 %v755_v20  ;;  %v750_v20 = vld [vmem:[#allocation2 + $0x370] sm:$0xff] }
  0xcd   : > { %848 = vmatpush1.msra.mxu0 %v754_v21  ;;  %v741_v21 = vld [vmem:[#allocation2 + $0x328] sm:$0xff] }
  0xce   : > { %849 = vmatprep.subr.mxu0 %v747_v22  ;;  %v743_v22 = vld [vmem:[#allocation2 + $0x338] sm:$0xff] }
  0xcf   : > { %850 = vmatpush1.msra.mxu0 %v746_v23  ;;  %v740_v23 = vld [vmem:[#allocation2 + $0x320] sm:$0xff] }
  0xd0   : > { %851 = vmatprep.subr.mxu0 %v739_v24  ;;  %v742_v24 = vld [vmem:[#allocation2 + $0x330] sm:$0xff] }
  0xd1   : > { %852 = vmatpush1.msra.mxu0 %v738_v25  ;;  %v733_v25 = vld [vmem:[#allocation2 + $0x2e8] sm:$0xff] }
  0xd2   : > { %853 = vmatprep.subr.mxu0 %v731_v26  ;;  %v735_v26 = vld [vmem:[#allocation2 + $0x2f8] sm:$0xff] }
  0xd3   : > { %854 = vmatpush1.msra.mxu0 %v730_v27  ;;  %v732_v27 = vld [vmem:[#allocation2 + $0x2e0] sm:$0xff] }
  0xd4   : > { %855 = vmatprep.subr.mxu0 %v723_v28  ;;  %v734_v28 = vld [vmem:[#allocation2 + $0x2f0] sm:$0xff] }
  0xd5   : > { %856 = vmatpush1.msra.mxu0 %v722_v29  ;;  %v725_v29 = vld [vmem:[#allocation2 + $0x2a8] sm:$0xff] }
  0xd6   : > { %857 = vmatprep.subr.mxu0 %v715_v30  ;;  %v727_v30 = vld [vmem:[#allocation2 + $0x2b8] sm:$0xff] }
  0xd7   : > { %858 = vmatpush1.msra.mxu0 %v714_v31  ;;  %v724_v31 = vld [vmem:[#allocation2 + $0x2a0] sm:$0xff] }
  0xd8   : > { %859 = vmatprep.subr.mxu0 %v707_v32  ;;  %v726_v32 = vld [vmem:[#allocation2 + $0x2b0] sm:$0xff] }
  0xd9   : > { %860 = vmatpush1.msra.mxu0 %v706_v33  ;;  %v717_v33 = vld [vmem:[#allocation2 + $0x268] sm:$0xff] }
  0xda   : > { %861 = vmatprep.subr.mxu0 %v699_v34  ;;  %v719_v34 = vld [vmem:[#allocation2 + $0x278] sm:$0xff] }
  0xdb   : > { %862 = vmatpush1.msra.mxu0 %v698_v35  ;;  %v716_v35 = vld [vmem:[#allocation2 + $0x260] sm:$0xff] }
  0xdc   : > { %863 = vmatprep.subr.mxu0 %v691_v36  ;;  %v718_v36 = vld [vmem:[#allocation2 + $0x270] sm:$0xff] }
  0xdd   : > { %864 = vmatpush1.msra.mxu0 %v690_v37  ;;  %v709_v37 = vld [vmem:[#allocation2 + $0x228] sm:$0xff] }
  0xde   : > { %865 = vmatprep.subr.mxu0 %v683_v38  ;;  %v711_v38 = vld [vmem:[#allocation2 + $0x238] sm:$0xff] }
  0xdf   : > { %866 = vmatpush1.msra.mxu0 %v682_v39  ;;  %v708_v39 = vld [vmem:[#allocation2 + $0x220] sm:$0xff] }
  0xe0   : > { %867 = vmatprep.subr.mxu0 %v675_v43  ;;  %v710_v43 = vld [vmem:[#allocation2 + $0x230] sm:$0xff] }
  0xe1   : > { %868 = vmatpush1.msra.mxu0 %v674_v45  ;;  %v701_v45 = vld [vmem:[#allocation2 + $0x1e8] sm:$0xff] }
  0xe2   : > { %869 = vmatprep.subr.mxu0 %v667_v47  ;;  %v700_v47 = vld [vmem:[#allocation2 + $0x1e0] sm:$0xff] }
  0xe3   : > { %870 = vmatpush1.msra.mxu0 %v666_v49  ;;  %v693_v49 = vld [vmem:[#allocation2 + $0x1a8] sm:$0xff] }
  0xe4   : > { %871 = vmatprep.subr.mxu0 %v659_v51  ;;  %v692_v51 = vld [vmem:[#allocation2 + $0x1a0] sm:$0xff] }
  0xe5   : > { %872 = vmatpush1.msra.mxu0 %v658_v53  ;;  %v685_v53 = vld [vmem:[#allocation2 + $0x168] sm:$0xff] }
  0xe6   : > { %873 = vmatprep.subr.mxu0 %v651_v55  ;;  %v684_v55 = vld [vmem:[#allocation2 + $0x160] sm:$0xff] }
  0xe7   : > { %874 = vmatpush1.msra.mxu0 %v650_v57  ;;  %v677_v57 = vld [vmem:[#allocation2 + $0x128] sm:$0xff] }
  0xe8   : > { %875 = vmatprep.subr.mxu0 %v643_v59  ;;  %v676_v59 = vld [vmem:[#allocation2 + $0x120] sm:$0xff] }
  0xe9   : > { %876 = vmatpush1.msra.mxu0 %v642_v61  ;;  %v669_v61 = vld [vmem:[#allocation2 + $0xe8] sm:$0xff] }
  0xea   : > { %999 = vmatprep.subr.mxu0 %v767_v63  ;;  %v668_v63 = vld [vmem:[#allocation2 + $0xe0] sm:$0xff] }
 0x18a   : > { %v1572_v1 = vpop.f32.mrf.mxu0 }
 0x18b   : > { %v628_v6 = vmul.f32 %v1572_v1, %v1535_v2  ;;  %v670_v1 = vld [vmem:[#allocation2 + $0xf0] sm:$0xff] }
 0x18c   : > { %v611_v3 = vpop.f32.mrf.mxu0 }
 0x18d   : > { %v627_v4 = vmul.f32 %v1535_v2, %v611_v3  ;;  %v637_v13 = vadd.f32 %v1536_v5, %v628_v6  ;;  %v661_v2 = vld [vmem:[#allocation2 + $0xa8] sm:$0xff]  ;;  %v663_v3 = vld [vmem:[#allocation2 + $0xb8] sm:$0xff] }
 0x18e   : > { %v653_v6 = vld [vmem:[#allocation2 + $0x68] sm:$0xff] }
 0x18f   : > { %v636_v7 = vadd.f32 %v1536_v5, %v627_v4  ;;  %v1977_v18 = vmax.f32 %v637_v13, 0.0  ;;  %v660_v4 = vld [vmem:[#allocation2 + $0xa0] sm:$0xff]  ;;  %v662_v5 = vld [vmem:[#allocation2 + $0xb0] sm:$0xff] }
 0x190   : > { %v644_v13 = vld [vmem:[#allocation2 + $0x20] sm:$0xff] }
 0x191   : > { %v1973_v8 = vmax.f32 %v636_v7, 0.0  ;;  %v655_v7 = vld [vmem:[#allocation2 + $0x78] sm:$0xff] }
 0x193   : > { %833 = vmatmul.mubr.f32.vlgmr.msra.gmra.mxu1 %v1973_v8  ;;  %910 = vmatmul.mubr.f32.vlgmr.msra.gmra.mxu0 %v1973_v8 }
 0x194   : > { %923 = vmatpush1.msra.mxu1 %v764_v9  ;;  %1000 = vmatpush1.msra.mxu0 %v766_v10  ;;  %v652_v9 = vld [vmem:[#allocation2 + $0x60] sm:$0xff]  ;;  %v654_v10 = vld [vmem:[#allocation2 + $0x70] sm:$0xff] }
 0x195   : > { %924 = vmatprep.subr.mxu1 %v757_v11  ;;  %1001 = vmatprep.subr.mxu0 %v759_v12  ;;  %v645_v11 = vld [vmem:[#allocation2 + $0x28] sm:$0xff]  ;;  %v647_v12 = vld [vmem:[#allocation2 + $0x38] sm:$0xff] }
 0x196   : > { %925 = vmatpush1.msra.mxu1 %v756_v14  ;;  %1002 = vmatpush1.msra.mxu0 %v758_v15  ;;  %v646_v14 = vld [vmem:[#allocation2 + $0x30] sm:$0xff] }
 0x197   : > { %838 = vmatprep.mubr.f32.mxu1 %v1768_v0  ;;  %915 = vmatprep.mubr.f32.mxu0 %v1768_v0 }
 0x198   : > { %926 = vmatprep.subr.mxu1 %v749_v16  ;;  %1003 = vmatprep.subr.mxu0 %v751_v17 }
 0x199   : > { %839 = vmatmul.mubr.f32.gmra.mxu1 %v1977_v18  ;;  %916 = vmatmul.mubr.f32.gmra.mxu0 %v1977_v18 }
 0x19a   : > { %927 = vmatpush1.msra.mxu1 %v748_v19  ;;  %1004 = vmatpush1.msra.mxu0 %v750_v20 }
 0x19b   : > { %928 = vmatprep.subr.mxu1 %v741_v21  ;;  %1005 = vmatprep.subr.mxu0 %v743_v22  ;;  %v1092_v22 = vsub.s32 3, %v1939_v40 }
 0x19c   : > { %929 = vmatpush1.msra.mxu1 %v740_v23  ;;  %1006 = vmatpush1.msra.mxu0 %v742_v24 }
 0x19d   : > { %930 = vmatprep.subr.mxu1 %v733_v25  ;;  %1007 = vmatprep.subr.mxu0 %v735_v26 }
 0x19e   : > { %931 = vmatpush1.msra.mxu1 %v732_v27  ;;  %1008 = vmatpush1.msra.mxu0 %v734_v28  ;;  %v1134_v27 = vld [vmem:[%s2058_s10] sm:$0xff] }
 0x19f   : > { %932 = vmatprep.subr.mxu1 %v725_v29  ;;  %1009 = vmatprep.subr.mxu0 %v727_v30 }
 0x1a0   : > { %933 = vmatpush1.msra.mxu1 %v724_v31  ;;  %1010 = vmatpush1.msra.mxu0 %v726_v32 }
 0x1a1   : > { %934 = vmatprep.subr.mxu1 %v717_v33  ;;  %1011 = vmatprep.subr.mxu0 %v719_v34  ;;  %v1143_v33 = vrot.slane %v1134_v27, %v1945_v42 }
 0x1a2   : > { %935 = vmatpush1.msra.mxu1 %v716_v35  ;;  %1012 = vmatpush1.msra.mxu0 %v718_v36  ;;  %v1151_v35 = vrot.slane %v1134_v27, %v1092_v22 }
 0x1a3   : > { %936 = vmatprep.subr.mxu1 %v709_v37  ;;  %1013 = vmatprep.subr.mxu0 %v711_v38  ;;  %v1139_v37 = vrot.slane %v1134_v27, %v1942_v41 }
 0x1a4   : > { %937 = vmatpush1.msra.mxu1 %v708_v39  ;;  %1014 = vmatpush1.msra.mxu0 %v710_v43  ;;  %v1147_v39 = vrot.slane %v1134_v27, %v1951_v44 }
 0x1a5   : > { %938 = vmatprep.subr.mxu1 %v701_v45  ;;  %1015 = vmatprep.subr.mxu0 %v703_v46 }
 0x1a6   : > { %939 = vmatpush1.msra.mxu1 %v700_v47  ;;  %1016 = vmatpush1.msra.mxu0 %v702_v48 }
 0x1a7   : > { %940 = vmatprep.subr.mxu1 %v693_v49  ;;  %1017 = vmatprep.subr.mxu0 %v695_v50 }
 0x1a8   : > { %941 = vmatpush1.msra.mxu1 %v692_v51  ;;  %1018 = vmatpush1.msra.mxu0 %v694_v52 }
 0x1a9   : > { %942 = vmatprep.subr.mxu1 %v685_v53  ;;  %1019 = vmatprep.subr.mxu0 %v687_v54 }
 0x1aa   : > { %943 = vmatpush1.msra.mxu1 %v684_v55  ;;  %1020 = vmatpush1.msra.mxu0 %v686_v56 }
 0x1ab   : > { %944 = vmatprep.subr.mxu1 %v677_v57  ;;  %1021 = vmatprep.subr.mxu0 %v679_v58 }
 0x1ac   : > { %945 = vmatpush1.msra.mxu1 %v676_v59  ;;  %1022 = vmatpush1.msra.mxu0 %v678_v60 }
 0x1ad   : > { %946 = vmatprep.subr.mxu1 %v669_v61  ;;  %1023 = vmatprep.subr.mxu0 %v671_v62  ;;  %v1096_v61 = vsub.s32 4, %v1939_v40  ;;  %v1104_v62 = vsub.s32 6, %v1939_v40 }
 0x1ae   : > { %947 = vmatpush1.msra.mxu1 %v668_v63  ;;  %1024 = vmatpush1.msra.mxu0 %v670_v1  ;;  %v1100_v63 = vsub.s32 5, %v1939_v40  ;;  %v1108_v1 = vsub.s32 7, %v1939_v40 }
 0x1af   : > { %948 = vmatprep.subr.mxu1 %v661_v2  ;;  %1025 = vmatprep.subr.mxu0 %v663_v3 }
 0x1b0   : > { %949 = vmatpush1.msra.mxu1 %v660_v4  ;;  %1026 = vmatpush1.msra.mxu0 %v662_v5 }
 0x1b1   : > { %950 = vmatprep.subr.mxu1 %v653_v6  ;;  %1027 = vmatprep.subr.mxu0 %v655_v7 }
 0x1b2   : > { %951 = vmatpush1.msra.mxu1 %v652_v9  ;;  %1028 = vmatpush1.msra.mxu0 %v654_v10 }
 0x1b3   : > { %952 = vmatprep.subr.mxu1 %v645_v11  ;;  %1029 = vmatprep.subr.mxu0 %v647_v12 }
 0x1b4   : > { %953 = vmatpush1.msra.mxu1 %v644_v13  ;;  %986 = vmatprep.mubr.f32.mxu1 %v1768_v0 }
 0x1b5   : > { %1030 = vmatpush1.msra.mxu0 %v646_v14  ;;  %1063 = vmatprep.mubr.f32.mxu0 %v1768_v0 }
 0x1b6   : > { %987 = vmatmul.mubr.f32.vlgmr.msra.gmra.mxu1 %v1973_v8  ;;  %1064 = vmatmul.mubr.f32.vlgmr.msra.gmra.mxu0 %v1973_v8  ;;  %v1076_v8 = vld [vmem:[%s2057_s9] sm:$0xff] }
 0x1b7   : > { %992 = vmatprep.mubr.f32.mxu1 %v1768_v0  ;;  %1069 = vmatprep.mubr.f32.mxu0 %v1768_v0  ;;  %v1085_v0 = vrot.slane %v1076_v8, %v1945_v42  ;;  %v1093_v25 = vrot.slane %v1076_v8, %v1092_v22  ;;  %v1081_v26 = vrot.slane %v1076_v8, %v1942_v41 }
 0x1b8   : > { %v1097_v6 = vrot.slane %v1076_v8, %v1096_v61  ;;  %v1105_v7 = vrot.slane %v1076_v8, %v1104_v62  ;;  %v1101_v9 = vrot.slane %v1076_v8, %v1100_v63  ;;  %v1109_v10 = vrot.slane %v1076_v8, %v1108_v1 }
 0x1ba   : > { %993 = vmatmul.mubr.f32.gmra.mxu1 %v1977_v18  ;;  %1070 = vmatmul.mubr.f32.gmra.mxu0 %v1977_v18  ;;  %v1089_v18 = vrot.slane %v1076_v8, %v1951_v44 }
 0x253   : > { %v834_v15 = vpop.f32.mrf.mxu1  ;;  %v911_v16 = vpop.f32.mrf.mxu0 }
 0x254   : > { %v1118_v36 = vmul.f32 %v1081_v26, %v834_v15  ;;  %v1120_v38 = vmul.f32 %v1089_v18, %v911_v16 }
 0x255   : > { %v836_v17 = vpop.f32.mrf.mxu1  ;;  %v913_v19 = vpop.f32.mrf.mxu0 }
 0x256   : > { %v1119_v32 = vmul.f32 %v1085_v0, %v836_v17  ;;  %v1121_v34 = vmul.f32 %v1093_v25, %v913_v19  ;;  %v1176_v50 = vadd.f32 %v1139_v37, %v1118_v36  ;;  %v1178_v51 = vadd.f32 %v1147_v39, %v1120_v38 }
 0x257   : > { %v1155_v19 = vrot.slane %v1134_v27, %v1096_v61 }
 0x258   : > { %v1177_v48 = vadd.f32 %v1143_v33, %v1119_v32  ;;  %v1179_v49 = vadd.f32 %v1151_v35, %v1121_v34  ;;  %v1192_v57 = vmax.f32 %v1176_v50, 0.0  ;;  %v1194_v58 = vmax.f32 %v1178_v51, 0.0 }
 0x259   : > { %v840_v20 = vpop.f32.mrf.mxu1  ;;  %v917_v21 = vpop.f32.mrf.mxu0  ;;  %v1769_v32 = vmov 1966171168  }
 0x25a   : > { %v1126_v30 = vmul.f32 %v1081_v26, %v840_v20  ;;  %v1128_v31 = vmul.f32 %v1089_v18, %v917_v21  ;;  %v1193_v55 = vmax.f32 %v1177_v48, 0.0  ;;  %v1195_v56 = vmax.f32 %v1179_v49, 0.0 }
 0x25b   : > { %v842_v23 = vpop.f32.mrf.mxu1  ;;  %v919_v24 = vpop.f32.mrf.mxu0  ;;  %v1163_v21 = vrot.slane %v1134_v27, %v1104_v62  ;;  %v1167_v26 = vrot.slane %v1134_v27, %v1108_v1 }
 0x25c   : > { %v1127_v28 = vmul.f32 %v1085_v0, %v842_v23  ;;  %v1129_v29 = vmul.f32 %v1093_v25, %v919_v24  ;;  %v1184_v46 = vadd.f32 %v1139_v37, %v1126_v30  ;;  %v1186_v47 = vadd.f32 %v1147_v39, %v1128_v31 }
 0x25d   : > { %v1159_v0 = vrot.slane %v1134_v27, %v1100_v63 }
 0x25e   : > { %v1185_v43 = vadd.f32 %v1143_v33, %v1127_v28  ;;  %v1187_v45 = vadd.f32 %v1151_v35, %v1129_v29  ;;  %v1200_v54 = vmax.f32 %v1184_v46, 0.0  ;;  %v1202_v42 = vmax.f32 %v1186_v47, 0.0 }
 0x25f   : > { %v1310_v33 = vunpack.c.l.s4 %v1769_v32 }
 0x260   : > { %v1201_v52 = vmax.f32 %v1185_v43, 0.0  ;;  %v1203_v53 = vmax.f32 %v1187_v45, 0.0  ;;  %v1237_v60 = vmax.f32 %v1192_v57, %v1200_v54  ;;  %v1251_v44 = vmax.f32 %v1194_v58, %v1202_v42 }
 0x262   : > { %v1244_v41 = vmax.f32 %v1193_v55, %v1201_v52  ;;  %v1258_v59 = vmax.f32 %v1195_v56, %v1203_v53  ;;  %v1238_v4 = vrot.slane %v1237_v60, 4  ;;  %v1252_v5 = vrot.slane %v1251_v44, 4 }
 0x264   : > { %v1245_v2 = vrot.slane %v1244_v41, 4  ;;  %v1259_v3 = vrot.slane %v1258_v59, 4  ;;  %v1239_v15 = vmax.f32 %v1237_v60, %v1238_v4  ;;  %v1253_v16 = vmax.f32 %v1251_v44, %v1252_v5 }
 0x266   : > { %v1246_v11 = vmax.f32 %v1244_v41, %v1245_v2  ;;  %v1260_v12 = vmax.f32 %v1258_v59, %v1259_v3  ;;  %v1240_v30 = vrot.slane %v1239_v15, 2  ;;  %v1254_v31 = vrot.slane %v1253_v16, 2 }
 0x268   : > { %v1247_v18 = vrot.slane %v1246_v11, 2  ;;  %v1261_v28 = vrot.slane %v1260_v12, 2  ;;  %v1241_v51 = vmax.f32 %v1239_v15, %v1240_v30  ;;  %v1255_v52 = vmax.f32 %v1253_v16, %v1254_v31 }
 0x26a   : > { %v1248_v48 = vmax.f32 %v1246_v11, %v1247_v18  ;;  %v1262_v27 = vmax.f32 %v1260_v12, %v1261_v28  ;;  %v1242_v3 = vrot.slane %v1241_v51, 1  ;;  %v1256_v4 = vrot.slane %v1255_v52, 1 }
 0x26c   : > { %v1249_v44 = vrot.slane %v1248_v48, 1  ;;  %v1263_v61 = vrot.slane %v1262_v27, 1 }
 0x26e   : > { %v1250_v11 = vmax.f32 %v1248_v48, %v1249_v44  ;;  %v1264_v12 = vmax.f32 %v1262_v27, %v1263_v61 }
 0x276   : > { %v988_v13 = vpop.f32.mrf.mxu1  ;;  %v1065_v14 = vpop.f32.mrf.mxu0 }
 0x277   : > { %v1122_v17 = vmul.f32 %v1097_v6, %v988_v13  ;;  %v1124_v20 = vmul.f32 %v1105_v7, %v1065_v14 }
 0x278   : > { %v990_v22 = vpop.f32.mrf.mxu1  ;;  %v1067_v23 = vpop.f32.mrf.mxu0 }
 0x279   : > { %v1123_v24 = vmul.f32 %v1101_v9, %v990_v22  ;;  %v1125_v25 = vmul.f32 %v1109_v10, %v1067_v23  ;;  %v1180_v34 = vadd.f32 %v1155_v19, %v1122_v17  ;;  %v1182_v35 = vadd.f32 %v1163_v21, %v1124_v20 }
 0x27a   : > { %v994_v29 = vpop.f32.mrf.mxu1  ;;  %v1071_v8 = vpop.f32.mrf.mxu0  ;;  %v1243_v17 = vmax.f32 %v1241_v51, %v1242_v3 }
 0x27b   : > { %v1130_v36 = vmul.f32 %v1097_v6, %v994_v29  ;;  %v1132_v37 = vmul.f32 %v1105_v7, %v1071_v8  ;;  %v1181_v43 = vadd.f32 %v1159_v0, %v1123_v24  ;;  %v1183_v45 = vadd.f32 %v1167_v26, %v1125_v25 }
 0x27c   : > { %v996_v38 = vpop.f32.mrf.mxu1  ;;  %v1073_v39 = vpop.f32.mrf.mxu0  ;;  %v1196_v42 = vmax.f32 %v1180_v34, 0.0  ;;  %v1198_v55 = vmax.f32 %v1182_v35, 0.0  ;;  %v1311_v7 = vunpack.c.0.s8 %v1310_v33 }
 0x27d   : > { %v1131_v46 = vmul.f32 %v1101_v9, %v996_v38  ;;  %v1133_v47 = vmul.f32 %v1109_v10, %v1073_v39  ;;  %v1188_v49 = vadd.f32 %v1155_v19, %v1130_v36  ;;  %v1190_v50 = vadd.f32 %v1163_v21, %v1132_v37 }
 0x27e   : > { %v1197_v58 = vmax.f32 %v1181_v43, 0.0  ;;  %v1199_v41 = vmax.f32 %v1183_v45, 0.0  ;;  %v1257_v19 = vmax.f32 %v1255_v52, %v1256_v4  ;;  %v1314_v22 = vsub.s32 %v1311_v7, %v1939_v40 }
 0x27f   : > { %v1189_v53 = vadd.f32 %v1159_v0, %v1131_v46  ;;  %v1191_v54 = vadd.f32 %v1167_v26, %v1133_v47  ;;  %v1204_v56 = vmax.f32 %v1188_v49, 0.0  ;;  %v1206_v57 = vmax.f32 %v1190_v50, 0.0 }
 0x280   : > { %v1305_v0 = vcombine.low %v1243_v17, %v1250_v11  ;;  %v1306_v25 = vcombine.low %v1257_v19, %v1264_v12 }
 0x281   : > { %v1205_v59 = vmax.f32 %v1189_v53, 0.0  ;;  %v1207_v60 = vmax.f32 %v1191_v54, 0.0  ;;  %v1265_v62 = vmax.f32 %v1196_v42, %v1204_v56  ;;  %v1279_v63 = vmax.f32 %v1198_v55, %v1206_v57 }
 0x282   : > { %v1315_v33 = vrot.slane %v1305_v0, %v1314_v22  ;;  %v1322_v34 = vrot.slane %v1306_v25, %v1314_v22 }
 0x283   : > { %v1272_v1 = vmax.f32 %v1197_v58, %v1205_v59  ;;  %v1286_v2 = vmax.f32 %v1199_v41, %v1207_v60  ;;  %v1266_v5 = vrot.slane %v1265_v62, 4  ;;  %v1280_v6 = vrot.slane %v1279_v63, 4 }
 0x284   : > { %v1337_v46 = vcombine.low %v1315_v33, %v1322_v34 }
 0x285   : > { %v1273_v9 = vrot.slane %v1272_v1, 4  ;;  %v1287_v10 = vrot.slane %v1286_v2, 4  ;;  %v1267_v13 = vmax.f32 %v1265_v62, %v1266_v5  ;;  %v1281_v14 = vmax.f32 %v1279_v63, %v1280_v6 }
 0x286   : > { %v1345_v48 = vrot.slane %v1337_v46, %v1314_v22 }
 0x287   : > { %v1274_v15 = vmax.f32 %v1272_v1, %v1273_v9  ;;  %v1288_v16 = vmax.f32 %v1286_v2, %v1287_v10  ;;  %v1268_v20 = vrot.slane %v1267_v13, 2  ;;  %v1282_v21 = vrot.slane %v1281_v14, 2 }
 0x289   : > { %v1275_v23 = vrot.slane %v1274_v15, 2  ;;  %v1289_v24 = vrot.slane %v1288_v16, 2  ;;  %v1269_v26 = vmax.f32 %v1267_v13, %v1268_v20  ;;  %v1283_v18 = vmax.f32 %v1281_v14, %v1282_v21 }
 0x28b   : > { %v1276_v28 = vmax.f32 %v1274_v15, %v1275_v23  ;;  %v1290_v29 = vmax.f32 %v1288_v16, %v1289_v24  ;;  %v1270_v8 = vrot.slane %v1269_v26, 1  ;;  %v1284_v30 = vrot.slane %v1283_v18, 1 }
 0x28d   : > { %v1277_v31 = vrot.slane %v1276_v28, 1  ;;  %v1291_v32 = vrot.slane %v1290_v29, 1  ;;  %v1271_v35 = vmax.f32 %v1269_v26, %v1270_v8  ;;  %v1285_v36 = vmax.f32 %v1283_v18, %v1284_v30 }
 0x28f   : > { %v1278_v37 = vmax.f32 %v1276_v28, %v1277_v31  ;;  %v1292_v40 = vmax.f32 %v1290_v29, %v1291_v32 }
 0x291   : > { %v1307_v38 = vcombine.low %v1271_v35, %v1278_v37  ;;  %v1308_v39 = vcombine.low %v1285_v36, %v1292_v40 }
 0x293   : > { %v1329_v43 = vrot.slane %v1307_v38, %v1314_v22  ;;  %v1336_v45 = vrot.slane %v1308_v39, %v1314_v22 }
 0x295   : > { %v1338_v47 = vcombine.low %v1329_v43, %v1336_v45 }
 0x297   : > { %v1352_v27 = vrot.slane %v1338_v47, %v1314_v22 }
 0x299   : > { %v1353_v49 = vcombine.low %v1345_v48, %v1352_v27 }
 0x29b   : > { %1355 = vst [vmem:[%s417_s12] sm:$0xff] %v1353_v49 }
 0x29c   : > { %1693 = shalt.err (!%p1690_p3)
}
 0x29d   : > { %s1694_s26 = scalar_lea.hbm %s1434_s28, 128  ;;  %s1698_s12 = scalar_lea.hbm %s2059_s11, 1024 }
 0x29e   : > { %p1695_p5 = scmp.ne.s32.totalorder %s1434_s28, %s1694_s26  ;;  %p1699_p9 = scmp.lt.s32.totalorder %s1434_s28, %s2059_s11 }
 0x29f   : > { %p1700_p12 = scmp.lt.s32.totalorder %s1698_s12, %s1694_s26 }
 0x2a0   : > { %p1696_p6 = pnand %p1695_p5, %p1871_p4 }
 0x2a1   : > { %p1701_p10 = por %p1700_p12, %p1699_p9 }
 0x2a2   : > { %p1697_p7 = pneg %p1696_p6 }
 0x2a4   : > { %p1702_p11 = pnand %p1701_p10, %p1697_p7 }
 0x2a6   : > { %1705 = shalt.err (!%p1702_p11)
}
 0x2a7   : > { %1577 = dma.vmem_to_hbm [thread:$0]  (%p1871_p4), %s1437_s23, 128, %s1434_s28, %s1422_s14  }
 0x2a8 PF: > { %p1589_p13 = scmp.ge.s32.totalorder %s1760_s22, 2  ;;  %s1448_s0 = sand.u32 1, %s1740_s17  }
 0x2a9   : > { %s1449_s1 = scalar_lea.sflag [#allocation4], %s1448_s0 }
 0x2aa   : > { %p1584_p0 = pnand %p1589_p13, %p1878_p8 }
 0x2ac   : > { %p1585_p1 = pneg %p1584_p0 }
 0x2ae   : > { %1735 = dma.done.wait (%p1585_p1), %s1449_s1, 128  }
 0x2af   : > { %1737 = vsyncadd (%p1585_p1), %s1449_s1, 4294967168  ;;  %s25_s22 = sadd.s32 1, %s1760_s22   ;;  %s2070_s17 = smov %s1744_s18 }
 0x2b0   : > { %p22_p2 = scmp.ge.s32.totalorder %s25_s22, 10   ;;  %s2071_s18 = smov %s1748_s19 }
 0x2b1   : > { %s2072_s19 = smov %s1884_s30  ;;  %s2073_s20 = smov %s1756_s21 }
 0x2b2   : > { %s2074_s21 = smov %s2076_s25  ;;  %24 = sbr.rel (!%p22_p2) target bundleno = 9 (0x9), region = 112 }
 0x2b7   :  { %1454 = vsyncpa [#allocation3], 1 }
 0x2b8   :  { %1456 = vsyncpa [#allocation3 + $0x1], 1 }
 0x2b9   :  { %1457 = vsyncpa [#allocation4], 1 }
 0x2ba   :  { %1459 = vsyncpa [#allocation4 + $0x1], 1 }

</bundles_post_ra>
